<compile_context>
chip_gen: v5e
topology: v5e:2x2
jax: 0.10.0
libtpu: 0.0.40
codegen_flags: <defaults>
</compile_context>

<pallas_src>
import functools

import jax
import jax.numpy as jnp
import numpy as np
from jax.experimental import pallas as pl
from jax.experimental.pallas import tpu as pltpu


def _round_up(x, m):
    return ((x + m - 1) // m) * m


def vit_embed_kernel(patch_ref, wt_ref, pospb_ref, out_ref):
    # patch_ref: (1, TM, K)  bf16   flattened patch pixels for one row-tile
    # wt_ref:    (K, Hp)     bf16   projection weight (grid-invariant)
    # pospb_ref: (1, TM, Hp) f32    pos-embedding rows 1..N with conv bias folded in
    # out_ref:   (1, TM, Hp) f32
    proj = jnp.dot(patch_ref[0], wt_ref[...],
                   preferred_element_type=jnp.float32)     # MXU: bf16 in, f32 acc
    out_ref[0] = proj + pospb_ref[0]                        # f32 epilogue (VPU)


@functools.partial(jax.jit, static_argnames=("patch_size",))
def vit_embeddings_forward(pixel_values, proj_w, proj_b, cls_token, pos_emb,
                           patch_size):
    """ViTEmbeddings forward (eval mode). pixel_values: (B, C, H, W) f32 NCHW."""
    B, C, H, W = pixel_values.shape
    P = patch_size
    Hn, Wn = H // P, W // P
    N = Hn * Wn
    hidden = proj_w.shape[0]
    K = C * P * P

    # --- glue: non-overlapping patch extraction, (C, kh, kw) flatten order ---
    # TODO(synk): for a fully HBM-optimal path, accept NHWC input and fold the
    # patch gather into the BlockSpec index_map instead of this transpose.
    x = pixel_values.reshape(B, C, Hn, P, Wn, P)
    x = jnp.transpose(x, (0, 2, 4, 1, 3, 5))             # (B, Hn, Wn, C, P, P)
    patches = x.reshape(B, N, K).astype(jnp.bfloat16)    # bf16 MXU operand

    # Projection weight as the (K, hidden) RHS, bf16.  For repeated inference
    # this transpose/cast should be hoisted/cached outside the per-call path.
    wt = proj_w.reshape(hidden, K).T.astype(jnp.bfloat16)

    # Fold conv bias into the patch rows of the position embedding (stays f32).
    pos_pb = pos_emb[:, 1:, :] + proj_b[None, None, :]    # (1, N, hidden)

    # --- padding / tiling: lane-dense hidden, sublane-aligned row tiles ---
    Hp = _round_up(hidden, 128)
    N8 = _round_up(N, 8)
    if N8 <= 512:
        TM, N_pad = N8, N8
    else:
        TM, N_pad = 512, _round_up(N, 512)

    patches = jnp.pad(patches, ((0, 0), (0, N_pad - N), (0, 0)))
    wt = jnp.pad(wt, ((0, 0), (0, Hp - hidden)))
    pos_pb = jnp.pad(pos_pb, ((0, 0), (0, N_pad - N), (0, Hp - hidden)))

    n_m = N_pad // TM

    # VMEM budget: double-buffered activation/pos/out tiles + weight, headroom.
    patch_tile_b = TM * K * 2
    pos_tile_b = TM * Hp * 4
    out_tile_b = TM * Hp * 4
    w_b = K * Hp * 2
    vmem_need = 2 * (patch_tile_b + pos_tile_b + out_tile_b + w_b) + (2 << 20)
    vmem_limit = int(min(max(vmem_need, 16 << 20), 48 << 20))

    out = pl.pallas_call(
        vit_embed_kernel,
        out_shape=jax.ShapeDtypeStruct((B, N_pad, Hp), jnp.float32),
        grid=(B, n_m),
        in_specs=[
            pl.BlockSpec((1, TM, K), lambda b, m: (b, m, 0)),
            pl.BlockSpec((K, Hp), lambda b, m: (0, 0)),         # grid-invariant
            pl.BlockSpec((1, TM, Hp), lambda b, m: (0, m, 0)),  # invariant in b
        ],
        out_specs=pl.BlockSpec((1, TM, Hp), lambda b, m: (b, m, 0)),
        compiler_params=pltpu.CompilerParams(
            dimension_semantics=("parallel", "parallel"),
            vmem_limit_bytes=vmem_limit),
    )(patches, wt, pos_pb)

    # --- CLS row (+ its position embedding) prepended outside the kernel ---
    cls_row = jnp.broadcast_to(cls_token + pos_emb[:, 0:1, :], (B, 1, hidden))
    emb = jnp.concatenate([cls_row, out[:, :N, :hidden]], axis=1)
    # TODO(synk): nn.Dropout is identity here (eval mode / hidden_dropout=0).
    return emb


def reference_forward(pixel_values, proj_w, proj_b, cls_token, pos_emb,
                      patch_size):
    """Plain-JAX f32 reference mirroring the PyTorch module (eval mode)."""
    B = pixel_values.shape[0]
    dn = jax.lax.conv_dimension_numbers(pixel_values.shape, proj_w.shape,
                                        ("NCHW", "OIHW", "NCHW"))
    conv = jax.lax.conv_general_dilated(
        pixel_values, proj_w, (patch_size, patch_size), "VALID",
        dimension_numbers=dn)                             # (B, hidden, Hn, Wn)
    conv = conv + proj_b[None, :, None, None]
    B_, Hd, Hn, Wn = conv.shape
    emb = conv.reshape(B_, Hd, Hn * Wn).transpose(0, 2, 1)   # (B, N, hidden)
    cls = jnp.broadcast_to(cls_token, (B, 1, Hd))
    emb = jnp.concatenate([cls, emb], axis=1)
    emb = emb + pos_emb
    return emb


if __name__ == "__main__":
    # args (synthetic, small): image_size=16, patch_size=4, num_channels=4,
    # hidden_size=32, hidden_dropout=0.0 (eval mode).
    image_size, patch_size = 16, 4
    num_channels, hidden_size = 4, 32
    batch = 2
    num_patches = (image_size // patch_size) ** 2   # 16

    key = jax.random.PRNGKey(0)
    k1, k2, k3, k4, k5 = jax.random.split(key, 5)

    pixel_values = jax.random.normal(
        k1, (batch, num_channels, image_size, image_size), jnp.float32)

    # Conv2d(num_channels, hidden_size, kernel=patch, stride=patch) params.
    fan_in = num_channels * patch_size * patch_size
    bound = 1.0 / np.sqrt(fan_in)
    proj_w = jax.random.uniform(
        k2, (hidden_size, num_channels, patch_size, patch_size),
        jnp.float32, -bound, bound)
    proj_b = jax.random.uniform(k3, (hidden_size,), jnp.float32, -bound, bound)

    cls_token = jax.random.normal(k4, (1, 1, hidden_size), jnp.float32)
    pos_emb = jax.random.normal(k5, (1, num_patches + 1, hidden_size),
                                jnp.float32)

    out = vit_embeddings_forward(pixel_values, proj_w, proj_b, cls_token,
                                 pos_emb, patch_size=patch_size)
    out = jax.block_until_ready(out)

    ref = reference_forward(pixel_values, proj_w, proj_b, cls_token, pos_emb,
                            patch_size)
    # bf16 matmul inputs with f32 accumulation -> relaxed tolerance vs f32 ref.
    np.testing.assert_allclose(np.asarray(out), np.asarray(ref),
                               rtol=2e-2, atol=2e-2)
    print("KERNEL_OK")
</pallas_src>

<mosaic_0001>
module attributes {stable_mosaic.version = 11 : i64} {
  func.func @vit_embed_kernel(%arg0: i32, %arg1: i32, %arg2: memref<1x16x64xbf16, #tpu.memory_space<vmem>>, %arg3: memref<64x128xbf16, #tpu.memory_space<vmem>>, %arg4: memref<1x16x128xf32, #tpu.memory_space<vmem>>, %arg5: memref<1x16x128xf32, #tpu.memory_space<vmem>>) attributes {dimension_semantics = [#tpu.dimension_semantics<parallel>, #tpu.dimension_semantics<parallel>], iteration_bounds = array<i64: 2, 1>, scalar_prefetch = 0 : i64, scratch_operands = 0 : i64, tpu.core_type = #tpu.core_type<tc>, window_params = [{transform_indices = @transform_0, window_bounds = array<i64: 1, 16, 64>}, {pipeline_mode = #tpu.pipeline_mode<synchronous>, transform_indices = @transform_1, window_bounds = array<i64: 64, 128>}, {transform_indices = @transform_2, window_bounds = array<i64: 1, 16, 128>}, {transform_indices = @transform_3, window_bounds = array<i64: 1, 16, 128>}]} {
    %c0 = arith.constant 0 : index
    %c0_0 = arith.constant 0 : index
    %c0_1 = arith.constant 0 : index
    %0 = vector.load %arg2[%c0, %c0_0, %c0_1] : memref<1x16x64xbf16, #tpu.memory_space<vmem>>, vector<1x16x64xbf16>
    %1 = vector.shape_cast %0 : vector<1x16x64xbf16> to vector<16x64xbf16>
    %c0_2 = arith.constant 0 : index
    %c0_3 = arith.constant 0 : index
    %2 = vector.load %arg3[%c0_2, %c0_3] : memref<64x128xbf16, #tpu.memory_space<vmem>>, vector<64x128xbf16>
    %cst = arith.constant dense<0.000000e+00> : vector<16x128xf32>
    %3 = tpu.matmul %1, %2, %cst {dimension_numbers = #tpu.dot_dimension_numbers<[1], [0], [0], [1], [0, 0, 1, 1], [], []>} : vector<16x64xbf16>, vector<64x128xbf16>, vector<16x128xf32> -> vector<16x128xf32>
    %c0_4 = arith.constant 0 : index
    %c0_5 = arith.constant 0 : index
    %c0_6 = arith.constant 0 : index
    %4 = vector.load %arg4[%c0_4, %c0_5, %c0_6] : memref<1x16x128xf32, #tpu.memory_space<vmem>>, vector<1x16x128xf32>
    %5 = vector.shape_cast %4 : vector<1x16x128xf32> to vector<16x128xf32>
    %6 = arith.addf %3, %5 : vector<16x128xf32>
    %c0_7 = arith.constant 0 : index
    %c0_8 = arith.constant 0 : index
    %c0_9 = arith.constant 0 : index
    %7 = vector.load %arg5[%c0_7, %c0_8, %c0_9] : memref<1x16x128xf32, #tpu.memory_space<vmem>>, vector<1x16x128xf32>
    %8 = vector.shape_cast %7 : vector<1x16x128xf32> to vector<16x128xf32>
    %9 = vector.shape_cast %6 : vector<16x128xf32> to vector<1x16x128xf32>
    tpu.vector_store %arg5[%c0_7, %c0_8, %c0_9], %9 {strides = array<i32>} : memref<1x16x128xf32, #tpu.memory_space<vmem>>, vector<1x16x128xf32>,
    return
  }
  func.func @transform_0(%arg0: i32, %arg1: i32) -> (i32, i32, i32) {
    %c0_i32 = arith.constant 0 : i32
    %c0_i32_0 = arith.constant 0 : i32
    return %arg0, %arg1, %c0_i32 : i32, i32, i32
  }
  func.func @transform_1(%arg0: i32, %arg1: i32) -> (i32, i32) {
    %c0_i32 = arith.constant 0 : i32
    %c0_i32_0 = arith.constant 0 : i32
    %c0_i32_1 = arith.constant 0 : i32
    return %c0_i32, %c0_i32_0 : i32, i32
  }
  func.func @transform_2(%arg0: i32, %arg1: i32) -> (i32, i32, i32) {
    %c0_i32 = arith.constant 0 : i32
    %c0_i32_0 = arith.constant 0 : i32
    %c0_i32_1 = arith.constant 0 : i32
    return %c0_i32, %arg1, %c0_i32_0 : i32, i32, i32
  }
  func.func @transform_3(%arg0: i32, %arg1: i32) -> (i32, i32, i32) {
    %c0_i32 = arith.constant 0 : i32
    %c0_i32_0 = arith.constant 0 : i32
    return %arg0, %arg1, %c0_i32 : i32, i32, i32
  }
}

</mosaic_0001>

<bundles_post_ra>
// kernel: vit_embeddings_forward.1
= control target key start
LH: loop header
LB: loop body
LE: loop exit
PB: predicated region body
PF: predicated region fallthrough
CT: control target
= control target key end

     0   :  { %s504_s12 = smov 0   ;;  %s506_s13 = smov 0   ;;  %s555_s0 = inlined_call_operand.vmem [shape: bf16[2,16,64], index: 0, kind: input, shape index: {}]   ;;  %s556_s1 = inlined_call_operand.vmem [shape: bf16[64,128], index: 1, kind: input, shape index: {}]   ;;  %s557_s2 = inlined_call_operand.vmem [shape: f32[1,16,128], index: 2, kind: input, shape index: {}]   ;;  %s558_s3 = inlined_call_operand.vmem [shape: f32[2,16,128], index: 3, kind: output, shape index: {}]  }
   0x1   :  { %s508_s14 = smov 0  }
   0x2 LB: > { %s25_s15 = sadd.s32 1, %s478_s13  ;;  %p401_p0 = scmp.ge.s32.totalorder %s482_s14, 1  ;;  %s482_s14 = sphi %s508_s14, %s13_s14   ;;  %s478_s13 = sphi %s506_s13, %s560_s13   ;;  %s474_s12 = sphi %s504_s12, %s559_s12  }
   0x3   : > { %p27_p1 = scmp.ge.s32.totalorder %s25_s15, 2  ;;  %p169_p2 = scmp.lt.s32.totalorder %s482_s14, 3 }
   0x5   : > { %s562_s15 = smov (%p27_p1, %s25_s15), 0  ;;  %p170_p3 = pnand %p401_p0, %p169_p2 }
   0x6   : > { %p207_p4 = scmp.lt.s32.totalorder (!%p170_p3), %s474_s12, 1 }
   0x7   : > { %173 = sbr.rel (%p170_p3) target bundleno = 165 (0xa5), region = 32 }
   0xc   : > { %v435_v0 = vld [vmem:[%s556_s1 + $0x18] sm:$0xff]  ;;  %v434_v1 = vld [vmem:[%s556_s1 + $0x10] sm:$0xff]  ;;  %s564_s12 = smov (!%p207_p4, %s474_s12), 1  ;;  %v433_v2 = vld [vmem:[%s556_s1 + $0x8] sm:$0xff]  ;;  %vm274_vm0 = vcmask 523264  }
   0xd   : > { %282 = vmatpush.bf16.msra.mxu0 %v435_v0  ;;  %s429_s22 = sshll.u32 %s564_s12, 3  ;;  %v432_v3 = vld [vmem:[%s556_s1] sm:$0xff]  ;;  %s430_s28 = sshll.u32 %s564_s12, 4  ;;  %v244_v8 = vld [vmem:[%s557_s2 + $0x8] sm:$0xff] }
   0xe   : > { %s214_s27 = scalar_lea.vmem %s555_s0, %s429_s22  ;;  %v243_v5 = vld [vmem:[%s557_s2] sm:$0xff]  ;;  %s230_s6 = scalar_lea.vmem %s558_s3, %s430_s28 }
   0xf   : > { %v431_v4 = vld [vmem:[%s214_s27] sm:$0xff] }
  0x11   : > { %283 = vmatpush.bf16.msra.mxu0 %v434_v1 }
  0x15   : > { %284 = vmatpush.bf16.msra.mxu0 %v433_v2 }
  0x19   : > { %285 = vmatpush.bf16.msra.mxu0 %v432_v3 }
  0x1c   : > { %426 = vmatmul.msk.bf16.vlgmr.msra.gmra.mxu0 %vm274_vm0, %v431_v4 }
  0x99   : > { %v287_v6 = vpop.f32.mrf.mxu0 }
  0x9a   : > { %v288_v7 = vadd.f32 %v287_v6, %v243_v5 }
  0x9c   : > { %292 = vst [vmem:[%s230_s6] sm:$0xff] %v288_v7 }
  0xa1   : > { %v289_v9 = vpop.f32.mrf.mxu0 }
  0xa2   : > { %v290_v10 = vadd.f32 %v289_v9, %v244_v8 }
  0xa4   : > { %293 = vst [vmem:[%s230_s6 + $0x8] sm:$0xff] %v290_v10 }
  0xa5 PF: > { %s13_s14 = sadd.s32 1, %s482_s14   ;;  %s559_s12 = smov %s478_s13 }
  0xa6   : > { %p10_p5 = scmp.ge.s32.totalorder %s13_s14, 4   ;;  %s560_s13 = smov %s562_s15 }
  0xa8   :  { %12 = sbr.rel (!%p10_p5) target bundleno = 2 (0x2), region = 65 }

</bundles_post_ra>
